<compile_context>
chip_gen: v7x
topology: tpu7x:2x2x1
jax: 0.10.0
libtpu: 0.0.40
codegen_flags: <defaults>
</compile_context>

<pallas_src>
from typing import NamedTuple

import jax
import jax.numpy as jnp
from jax.experimental import pallas as pl
from jax.experimental.pallas import tpu as pltpu

N_STATES = 2
N_ACTIONS = 1
HIDDEN = 32

_LANES_MIN_BATCH = 128   # below this, use the gridless batch-on-sublanes path


# ---------------------------------------------------------------------------
# Kernels
# ---------------------------------------------------------------------------
def _critic_kernel_small(x_ref, w_ref, o_ref):
    """Gridless batch-on-sublanes path (small B).

    x_ref : [B, n_feats]    concat([states, actions], 1)
    w_ref : [4, H+8, H]     slab l rows 0..H-1 = W_l^T ([in, out], zero padded),
                            row H = bias.  Slab 3 row j = W4[j, :] (PyTorch
                            [out, in] row) so layer 4 is a lane reduction.
    o_ref : [B, n_actions]  Q values
    """
    n_feats = x_ref.shape[1]
    n_actions = o_ref.shape[1]
    H = w_ref.shape[2]

    # ---- layer 1: contraction over K = n_feats = 3 -> VPU broadcast FMAs ----
    h = w_ref[0, H:H + 1, :]                          # [1, H] bias row
    for i in range(n_feats):
        h = h + x_ref[:, i:i + 1] * w_ref[0, i:i + 1, :]
    h = jnp.maximum(h, 0.0)

    # ---- layers 2 & 3: 32x32 -> MXU ----
    for l in (1, 2):
        h = jnp.dot(h, w_ref[l, 0:H, :],
                    preferred_element_type=jnp.float32) + w_ref[l, H:H + 1, :]
        h = jnp.maximum(h, 0.0)

    # ---- layer 4: N = n_actions = 1 -> VPU multiply + lane reduction ----
    cols = [jnp.sum(h * w_ref[3, j:j + 1, :], axis=-1, keepdims=True)
            + w_ref[3, H:H + 1, j:j + 1]
            for j in range(n_actions)]
    q = cols[0] if n_actions == 1 else jnp.concatenate(cols, axis=-1)
    o_ref[...] = q.astype(o_ref.dtype)


def _critic_kernel_lanes(x_ref, w_ref, o_ref):
    """Gridded batch-on-lanes path (training batches).

    x_ref : [n_feats, TB]       transposed inputs, batch on the lane axis
    w_ref : [4, H, H+8]         slab l cols 0..H-1 = W_l ([out, in], zero
                                padded), col H = bias column.
    o_ref : [n_actions, TB]     lane-dense Q output
    """
    n_feats = x_ref.shape[0]
    n_actions = o_ref.shape[0]
    H = w_ref.shape[1]

    # ---- layer 1: K = 3 -> VPU broadcast FMAs (bias column as init) ----
    h = w_ref[0, :, H:H + 1]                          # [H, 1] bias column
    for i in range(n_feats):
        h = h + w_ref[0, :, i:i + 1] * x_ref[i:i + 1, :]
    h = jnp.maximum(h, 0.0)                           # [H, TB]

    # ---- layers 2 & 3: [H,H] x [H,TB] -> MXU, all vregs lane-dense ----
    for l in (1, 2):
        h = jnp.dot(w_ref[l, :, 0:H], h,
                    preferred_element_type=jnp.float32) + w_ref[l, :, H:H + 1]
        h = jnp.maximum(h, 0.0)

    # ---- layer 4: full [H,H] x [H,TB] matmul (rows >= n_actions are zero
    # weights), then keep the first n_actions rows -> lane-dense store ----
    q_full = jnp.dot(w_ref[3, :, 0:H], h, preferred_element_type=jnp.float32)
    q = q_full[0:n_actions, :] + w_ref[3, 0:n_actions, H:H + 1]
    o_ref[...] = q.astype(o_ref.dtype)


# ---------------------------------------------------------------------------
# Parameter packing (one-time layout prep; zero per-call transposes/reshapes)
# ---------------------------------------------------------------------------
class CriticParams(NamedTuple):
    w_row: jax.Array   # [4, H+8, H]  batch-on-sublanes layout ([in, out] + bias row)
    w_col: jax.Array   # [4, H, H+8]  batch-on-lanes layout   ([out, in] + bias col)


def init_critic_params(key, n_states=N_STATES, n_actions=N_ACTIONS, hidden=HIDDEN):
    """PyTorch-style uniform(-1/sqrt(fan_in), 1/sqrt(fan_in)); weights [out, in]."""
    dims = [(hidden, n_states + n_actions),
            (hidden, hidden),
            (hidden, hidden),
            (n_actions, hidden)]
    params = []
    for i, (fan_out, fan_in) in enumerate(dims):
        kw, kb = jax.random.split(jax.random.fold_in(key, i))
        bound = 1.0 / jnp.sqrt(jnp.float32(fan_in))
        w = jax.random.uniform(kw, (fan_out, fan_in), jnp.float32, -bound, bound)
        b = jax.random.uniform(kb, (fan_out,), jnp.float32, -bound, bound)
        params.append((w, b))
    return params


def pack_critic_params(params, hidden=HIDDEN):
    """Pack weights AND biases into one slab per layout (2 input DMAs total)."""
    (w1, b1), (w2, b2), (w3, b3), (w4, b4) = [
        (jnp.asarray(w, jnp.float32), jnp.asarray(b, jnp.float32)) for (w, b) in params
    ]
    H = hidden
    n_in1 = w1.shape[1]           # n_states + n_actions
    n_act = w4.shape[0]           # n_actions

    # batch-on-sublanes layout: rows 0..H-1 = W^T ([in, out]), row H = bias
    w_row = jnp.zeros((4, H + 8, H), jnp.float32)
    w_row = w_row.at[0, :n_in1, :].set(w1.T)
    w_row = w_row.at[1, :H, :].set(w2.T)
    w_row = w_row.at[2, :H, :].set(w3.T)
    w_row = w_row.at[3, :n_act, :].set(w4)          # row j = W4[j, :]
    w_row = w_row.at[0, H, :].set(b1)
    w_row = w_row.at[1, H, :].set(b2)
    w_row = w_row.at[2, H, :].set(b3)
    w_row = w_row.at[3, H, :n_act].set(b4)

    # batch-on-lanes layout: cols 0..H-1 = W ([out, in]), col H = bias
    w_col = jnp.zeros((4, H, H + 8), jnp.float32)
    w_col = w_col.at[0, :, :n_in1].set(w1)
    w_col = w_col.at[1, :, :H].set(w2)
    w_col = w_col.at[2, :, :H].set(w3)
    w_col = w_col.at[3, :n_act, :H].set(w4)
    w_col = w_col.at[0, :, H].set(b1)
    w_col = w_col.at[1, :, H].set(b2)
    w_col = w_col.at[2, :, H].set(b3)
    w_col = w_col.at[3, :n_act, H].set(b4)

    return CriticParams(w_row=w_row, w_col=w_col)


# ---------------------------------------------------------------------------
# Forward wrappers
# ---------------------------------------------------------------------------
def _forward_small(x, w_row, n_actions):
    B = x.shape[0]
    vmem = pl.BlockSpec(memory_space=pltpu.MemorySpace.VMEM)
    return pl.pallas_call(
        _critic_kernel_small,
        out_shape=jax.ShapeDtypeStruct((B, n_actions), jnp.float32),
        in_specs=[vmem, vmem],
        out_specs=vmem,
    )(x, w_row)


def _forward_lanes(x, w_col, n_actions, tb):
    B, F = x.shape
    tb = max(128, (tb // 128) * 128)                 # lane-aligned batch tile
    b_pad = pl.cdiv(B, tb) * tb
    xt = jnp.zeros((F, b_pad), jnp.float32).at[:, :B].set(x.T)

    out = pl.pallas_call(
        _critic_kernel_lanes,
        out_shape=jax.ShapeDtypeStruct((n_actions, b_pad), jnp.float32),
        grid_spec=pltpu.PrefetchScalarGridSpec(
            num_scalar_prefetch=0,
            grid=(b_pad // tb,),
            in_specs=[
                pl.BlockSpec((F, tb), lambda i: (0, i)),
                # constant index_map -> weight slab stays VMEM-resident
                pl.BlockSpec(w_col.shape, lambda i: (0, 0, 0)),
            ],
            out_specs=pl.BlockSpec((n_actions, tb), lambda i: (0, i)),
        ),
        compiler_params=pltpu.CompilerParams(
            dimension_semantics=("parallel",)),       # v7x: shard batch over 2 TCs
    )(xt, w_col)
    return out[:, :B].T                               # back to [B, n_actions]


def critic_forward(states, actions, packed_params, *, batch_block=512):
    """states: [B, n_states], actions: [B, n_actions] -> Q: [B, n_actions].

    Call with as many rows as possible per invocation (all agents / whole
    minibatch) — per-pallas_call overhead dwarfs the compute at small B.
    """
    states = jnp.asarray(states, jnp.float32)
    actions = jnp.asarray(actions, jnp.float32)
    n_actions = actions.shape[1]
    x = jnp.concatenate([states, actions], axis=1)    # one fused producer copy
    B = x.shape[0]

    if B < _LANES_MIN_BATCH:
        return _forward_small(x, packed_params.w_row, n_actions)

    tb = min(batch_block, pl.cdiv(B, 128) * 128)
    return _forward_lanes(x, packed_params.w_col, n_actions, tb)


def critic_forward_ref(states, actions, params):
    """Pure-JAX reference (PyTorch-layout params) for correctness checking."""
    x = jnp.concatenate([jnp.asarray(states, jnp.float32),
                         jnp.asarray(actions, jnp.float32)], axis=1)
    for i, (w, b) in enumerate(params):
        x = jnp.dot(x, w.T, precision=jax.lax.Precision.HIGHEST) + b
        if i < len(params) - 1:
            x = jnp.maximum(x, 0.0)
    return x


# ---------------------------------------------------------------------------
if __name__ == "__main__":
    key = jax.random.PRNGKey(0)
    k_param, k_s, k_a, k_s2, k_a2 = jax.random.split(key, 5)

    params = init_critic_params(k_param)              # PyTorch-layout params
    packed = pack_critic_params(params)               # one-time layout prep

    # --- small acting-style batch: gridless batch-on-sublanes path ---
    batch = 8
    states = jax.random.normal(k_s, (batch, N_STATES), jnp.float32)
    actions = jax.random.normal(k_a, (batch, N_ACTIONS), jnp.float32)
    q = jax.block_until_ready(critic_forward(states, actions, packed))
    q_ref = critic_forward_ref(states, actions, params)
    assert q.shape == (batch, N_ACTIONS)
    # kernel dots use default MXU precision; reference uses HIGHEST -> 1e-4 tol
    assert jnp.allclose(q, q_ref, atol=1e-4, rtol=1e-4), "small-path mismatch"

    # --- training-style batch: gridded batch-on-lanes path (parallel grid) ---
    big = 256
    states_b = jax.random.normal(k_s2, (big, N_STATES), jnp.float32)
    actions_b = jax.random.normal(k_a2, (big, N_ACTIONS), jnp.float32)
    q_b = jax.block_until_ready(
        critic_forward(states_b, actions_b, packed, batch_block=128))
    q_b_ref = critic_forward_ref(states_b, actions_b, params)
    assert q_b.shape == (big, N_ACTIONS)
    assert jnp.allclose(q_b, q_b_ref, atol=1e-4, rtol=1e-4), "lanes-path mismatch"

    print("KERNEL_OK")
</pallas_src>

<mosaic_0001>
module attributes {stable_mosaic.version = 11 : i64} {
  func.func @_critic_kernel_small(%arg0: memref<8x3xf32, #tpu.memory_space<vmem>>, %arg1: memref<4x40x32xf32, #tpu.memory_space<vmem>>, %arg2: memref<8x1xf32, #tpu.memory_space<vmem>>) attributes {dimension_semantics = [], scalar_prefetch = 0 : i64, scratch_operands = 0 : i64, tpu.core_type = #tpu.core_type<tc>} {
    %c0 = arith.constant 0 : index
    %c32 = arith.constant 32 : index
    %c0_0 = arith.constant 0 : index
    %0 = vector.load %arg1[%c0, %c32, %c0_0] : memref<4x40x32xf32, #tpu.memory_space<vmem>>, vector<1x1x32xf32>
    %1 = vector.shape_cast %0 : vector<1x1x32xf32> to vector<1x32xf32>
    %c0_1 = arith.constant 0 : index
    %c0_2 = arith.constant 0 : index
    %2 = vector.load %arg0[%c0_1, %c0_2] : memref<8x3xf32, #tpu.memory_space<vmem>>, vector<8x1xf32>
    %c0_3 = arith.constant 0 : index
    %c0_4 = arith.constant 0 : index
    %c0_5 = arith.constant 0 : index
    %3 = vector.load %arg1[%c0_3, %c0_4, %c0_5] : memref<4x40x32xf32, #tpu.memory_space<vmem>>, vector<1x1x32xf32>
    %4 = vector.shape_cast %3 : vector<1x1x32xf32> to vector<1x32xf32>
    %5 = vector.broadcast %2 : vector<8x1xf32> to vector<8x32xf32>
    %6 = vector.broadcast %4 : vector<1x32xf32> to vector<8x32xf32>
    %7 = arith.mulf %5, %6 : vector<8x32xf32>
    %8 = vector.broadcast %1 : vector<1x32xf32> to vector<8x32xf32>
    %9 = arith.addf %8, %7 : vector<8x32xf32>
    %c0_6 = arith.constant 0 : index
    %c1 = arith.constant 1 : index
    %10 = vector.load %arg0[%c0_6, %c1] : memref<8x3xf32, #tpu.memory_space<vmem>>, vector<8x1xf32>
    %c0_7 = arith.constant 0 : index
    %c1_8 = arith.constant 1 : index
    %c0_9 = arith.constant 0 : index
    %11 = vector.load %arg1[%c0_7, %c1_8, %c0_9] : memref<4x40x32xf32, #tpu.memory_space<vmem>>, vector<1x1x32xf32>
    %12 = vector.shape_cast %11 : vector<1x1x32xf32> to vector<1x32xf32>
    %13 = vector.broadcast %10 : vector<8x1xf32> to vector<8x32xf32>
    %14 = vector.broadcast %12 : vector<1x32xf32> to vector<8x32xf32>
    %15 = arith.mulf %13, %14 : vector<8x32xf32>
    %16 = arith.addf %9, %15 : vector<8x32xf32>
    %c0_10 = arith.constant 0 : index
    %c2 = arith.constant 2 : index
    %17 = vector.load %arg0[%c0_10, %c2] : memref<8x3xf32, #tpu.memory_space<vmem>>, vector<8x1xf32>
    %c0_11 = arith.constant 0 : index
    %c2_12 = arith.constant 2 : index
    %c0_13 = arith.constant 0 : index
    %18 = vector.load %arg1[%c0_11, %c2_12, %c0_13] : memref<4x40x32xf32, #tpu.memory_space<vmem>>, vector<1x1x32xf32>
    %19 = vector.shape_cast %18 : vector<1x1x32xf32> to vector<1x32xf32>
    %20 = vector.broadcast %17 : vector<8x1xf32> to vector<8x32xf32>
    %21 = vector.broadcast %19 : vector<1x32xf32> to vector<8x32xf32>
    %22 = arith.mulf %20, %21 : vector<8x32xf32>
    %23 = arith.addf %16, %22 : vector<8x32xf32>
    %cst = arith.constant 0.000000e+00 : f32
    %24 = vector.broadcast %cst : f32 to vector<8x32xf32>
    %25 = arith.maximumf %23, %24 : vector<8x32xf32>
    %c1_14 = arith.constant 1 : index
    %c0_15 = arith.constant 0 : index
    %c0_16 = arith.constant 0 : index
    %26 = vector.load %arg1[%c1_14, %c0_15, %c0_16] : memref<4x40x32xf32, #tpu.memory_space<vmem>>, vector<1x32x32xf32>
    %27 = vector.shape_cast %26 : vector<1x32x32xf32> to vector<32x32xf32>
    %cst_17 = arith.constant dense<0.000000e+00> : vector<8x32xf32>
    %28 = tpu.matmul %25, %27, %cst_17 {dimension_numbers = #tpu.dot_dimension_numbers<[1], [0], [0], [1], [0, 0, 1, 1], [], []>} : vector<8x32xf32>, vector<32x32xf32>, vector<8x32xf32> -> vector<8x32xf32>
    %c1_18 = arith.constant 1 : index
    %c32_19 = arith.constant 32 : index
    %c0_20 = arith.constant 0 : index
    %29 = vector.load %arg1[%c1_18, %c32_19, %c0_20] : memref<4x40x32xf32, #tpu.memory_space<vmem>>, vector<1x1x32xf32>
    %30 = vector.shape_cast %29 : vector<1x1x32xf32> to vector<1x32xf32>
    %31 = vector.broadcast %30 : vector<1x32xf32> to vector<8x32xf32>
    %32 = arith.addf %28, %31 : vector<8x32xf32>
    %cst_21 = arith.constant 0.000000e+00 : f32
    %33 = vector.broadcast %cst_21 : f32 to vector<8x32xf32>
    %34 = arith.maximumf %32, %33 : vector<8x32xf32>
    %c2_22 = arith.constant 2 : index
    %c0_23 = arith.constant 0 : index
    %c0_24 = arith.constant 0 : index
    %35 = vector.load %arg1[%c2_22, %c0_23, %c0_24] : memref<4x40x32xf32, #tpu.memory_space<vmem>>, vector<1x32x32xf32>
    %36 = vector.shape_cast %35 : vector<1x32x32xf32> to vector<32x32xf32>
    %cst_25 = arith.constant dense<0.000000e+00> : vector<8x32xf32>
    %37 = tpu.matmul %34, %36, %cst_25 {dimension_numbers = #tpu.dot_dimension_numbers<[1], [0], [0], [1], [0, 0, 1, 1], [], []>} : vector<8x32xf32>, vector<32x32xf32>, vector<8x32xf32> -> vector<8x32xf32>
    %c2_26 = arith.constant 2 : index
    %c32_27 = arith.constant 32 : index
    %c0_28 = arith.constant 0 : index
    %38 = vector.load %arg1[%c2_26, %c32_27, %c0_28] : memref<4x40x32xf32, #tpu.memory_space<vmem>>, vector<1x1x32xf32>
    %39 = vector.shape_cast %38 : vector<1x1x32xf32> to vector<1x32xf32>
    %40 = vector.broadcast %39 : vector<1x32xf32> to vector<8x32xf32>
    %41 = arith.addf %37, %40 : vector<8x32xf32>
    %cst_29 = arith.constant 0.000000e+00 : f32
    %42 = vector.broadcast %cst_29 : f32 to vector<8x32xf32>
    %43 = arith.maximumf %41, %42 : vector<8x32xf32>
    %c3 = arith.constant 3 : index
    %c0_30 = arith.constant 0 : index
    %c0_31 = arith.constant 0 : index
    %44 = vector.load %arg1[%c3, %c0_30, %c0_31] : memref<4x40x32xf32, #tpu.memory_space<vmem>>, vector<1x1x32xf32>
    %45 = vector.shape_cast %44 : vector<1x1x32xf32> to vector<1x32xf32>
    %46 = vector.broadcast %45 : vector<1x32xf32> to vector<8x32xf32>
    %47 = arith.mulf %43, %46 : vector<8x32xf32>
    %cst_32 = arith.constant dense<0.000000e+00> : vector<8xf32>
    %48 = vector.multi_reduction <add>, %47, %cst_32 [1] : vector<8x32xf32> to vector<8xf32>
    %49 = vector.shape_cast %48 : vector<8xf32> to vector<8x1xf32>
    %c3_33 = arith.constant 3 : index
    %c32_34 = arith.constant 32 : index
    %c0_35 = arith.constant 0 : index
    %50 = vector.load %arg1[%c3_33, %c32_34, %c0_35] : memref<4x40x32xf32, #tpu.memory_space<vmem>>, vector<1x1x1xf32>
    %51 = vector.shape_cast %50 : vector<1x1x1xf32> to vector<1x1xf32>
    %52 = vector.broadcast %51 : vector<1x1xf32> to vector<8x1xf32>
    %53 = arith.addf %49, %52 : vector<8x1xf32>
    %c0_36 = arith.constant 0 : index
    %c0_37 = arith.constant 0 : index
    %54 = vector.load %arg2[%c0_36, %c0_37] : memref<8x1xf32, #tpu.memory_space<vmem>>, vector<8x1xf32>
    tpu.vector_store %arg2[%c0_36, %c0_37], %53 {strides = array<i32>} : memref<8x1xf32, #tpu.memory_space<vmem>>, vector<8x1xf32>,
    return
  }
}

</mosaic_0001>

<bundles_post_ra>
// kernel: tpu_custom_call.1
= control target key start
LH: loop header
LB: loop body
LE: loop exit
PB: predicated region body
PF: predicated region fallthrough
CT: control target
= control target key end

     0   :  { %v319_v0 = vmov 0   ;;  %v320_v2 = vmov 2   ;;  %v321_v5 = vmov 1   ;;  %v322_v7 = vmov 0.0|0.0   ;;  %s397_s0 = inlined_call_operand.vmem [shape: f32[8,3], index: 0, kind: input, shape index: {}]   ;;  %s398_s1 = inlined_call_operand.vmem [shape: f32[4,40,32], index: 1, kind: input, shape index: {}]   ;;  %s399_s2 = inlined_call_operand.vmem [shape: f32[8,1], index: 2, kind: output, shape index: {}]  }
   0x1   :  { %315 = vset.pattern.permute.xlu0 %v319_v0  ;;  %v12_v1 = vld [vmem:[%s397_s0] sm:$0xff]  ;;  %317 = vset.pattern.permute.xlu1 %v320_v2  ;;  %v247_v3 = vld [vmem:[%s398_s1 + $0x28] sm:$0xff]  ;;  %v248_v4 = vld [vmem:[%s398_s1 + $0x30] sm:$0xff]  ;;  %vm323_vm0 = vmmov 0   ;;  %v324_v11 = vmov 0.0   ;;  %vm62_vm1 = vcmask 261120  }
   0x2   :  { %16 = vperm.xlu0 %315, %v12_v1   ;;  %42 = vperm.xlu1 %317, %v12_v1   ;;  %v298_v6 = vpack.c.bf16 %v248_v4, %v247_v3  ;;  %v249_v8 = vld [vmem:[%s398_s1 + $0x38] sm:$0xff]  ;;  %v250_v9 = vld [vmem:[%s398_s1 + $0x40] sm:$0xff]  ;;  %v254_v12 = vld [vmem:[%s398_s1 + $0x50] sm:$0xff]  ;;  %vm237_vm2 = vcmask 7168  }
   0x3   :  { %297 = vmatprep.subr.bf16.mxu0 %v322_v7  ;;  %303 = vmatprep.subr.bf16.mxu1 %v322_v7  ;;  %v301_v10 = vpack.c.bf16 %v250_v9, %v249_v8  ;;  %v255_v13 = vld [vmem:[%s398_s1 + $0x58] sm:$0xff]  ;;  %v243_v15 = vld [vmem:[%s398_s1] ss:$0 sm:$0xff]  ;;  %v245_v19 = vld [vmem:[%s398_s1 + $0x1] ss:$0 sm:$0xff] }
   0x4   :  { %299 = vmatpush3.bf16.msra.mxu0 %v298_v6  ;;  %283 = vmatprep.mubr.msk.f32.mxu0 %vm323_vm0, %v324_v11  ;;  %v304_v14 = vpack.c.bf16 %v255_v13, %v254_v12  ;;  %v244_v18 = vld [vmem:[%s398_s1 + $0x20] ss:$0 sm:$0xff]  ;;  %v246_v20 = vld [vmem:[%s398_s1 + $0x2] ss:$0 sm:$0xff]  ;;  %v257_v30 = vld [vmem:[%s398_s1 + $0x68] sm:$0xff] }
   0x5   :  { %300 = vmatprep.subr.bf16.mxu0 %v322_v7  ;;  %294 = vmatprep.mubr.msk.f32.mxu1 %vm323_vm0, %v324_v11  ;;  %v256_v29 = vld [vmem:[%s398_s1 + $0x60] sm:$0xff]  ;;  %v252_v32 = vld [vmem:[%s398_s1 + $0x48] ss:$0 sm:$0xff]  ;;  %v259_v37 = vld [vmem:[%s398_s1 + $0x70] ss:$0 sm:$0xff] }
   0x6   :  { %316 = vset.pattern.permute.xlu0 %v321_v5  ;;  %305 = vmatpush3.bf16.msra.mxu1 %v304_v14  ;;  %v307_v31 = vpack.c.bf16 %v257_v30, %v256_v29  ;;  %v262_v41 = vld [vmem:[%s398_s1 + $0x78] ss:$0 sm:$0xff] }
   0x7   :  { %31 = vperm.xlu0 %316, %v12_v1   ;;  %306 = vmatprep.subr.bf16.mxu1 %v322_v7  ;;  %v264_v45 = vld [vmem:[%s398_s1 + $0x98] ss:$0 sm:$0xff] }
   0x8   :  { %302 = vmatpush3.bf16.msra.mxu0 %v301_v10 }
   0xa   :  { %308 = vmatpush3.bf16.msra.mxu1 %v307_v31 }
   0xb   :  { %318 = vset.pattern.permute.xlu0 %v320_v2 }
  0x81   :  { %v17_v16 = vpop.permute.xlu0 %16  ;;  %v43_v21 = vpop.permute.xlu1 %42 }
  0x82   :  { %v23_v17 = vmul.f32 %v243_v15, %v17_v16  ;;  %v49_v25 = vmul.f32 %v246_v20, %v43_v21 }
  0x84   :  { %v28_v23 = vadd.f32 %v244_v18, %v23_v17 }
  0x86   :  { %v32_v22 = vpop.permute.xlu0 %31 }
  0x87   :  { %v38_v24 = vmul.f32 %v245_v19, %v32_v22 }
  0x89   :  { %v39_v26 = vadd.f32 %v38_v24, %v28_v23 }
  0x8b   :  { %v50_v27 = vadd.f32 %v49_v25, %v39_v26 }
  0x8d   :  { %v51_v28 = vmax.f32 %v50_v27, 0.0 }
  0x8f   :  { %284 = vmatmul.mubr.msk.f32.vlgmr.msra.gmra.mrb[0].mxu0 %vm62_vm1, %v51_v28 }
 0x162   :  { %v132_v33 = vpop.f32.mrb[0].mxu0 }
 0x163   :  { %v133_v34 = vadd.f32 %v252_v32, %v132_v33  ;;  %v285_v35 = vpop.f32.mrb[1].mxu0 }
 0x165   :  { %v136_v36 = vmax.f32 %v133_v34, 0.0 }
 0x167   :  { %295 = vmatmul.mubr.msk.f32.vlgmr.msra.gmra.mrb[0].mxu1 %vm62_vm1, %v136_v36 }
 0x23a   :  { %v216_v38 = vpop.f32.mrb[0].mxu1 }
 0x23b   :  { %v217_v39 = vadd.f32 %v259_v37, %v216_v38  ;;  %v296_v40 = vpop.f32.mrb[1].mxu1 }
 0x23d   :  { %v220_v42 = vmax.f32 %v217_v39, 0.0 }
 0x23f   :  { %v227_v43 = vmul.f32 %v262_v41, %v220_v42 }
 0x241   :  { %v228_v44 = vsel %vm62_vm1, %v227_v43, 0.0 }
 0x242   :  { %229 = vadd.xlane.f32.xlu1 %v228_v44 }
 0x2cf   :  { %v230_v46 = vpop.xlane.xlu1 %229 }
 0x2d0   :  { %v236_v47 = vadd.f32 %v264_v45, %v230_v46 }
 0x2d2   :  { %238 = vst.msk [vmem:[%s399_s2] sm:$0xff] %vm237_vm2, %v236_v47 }

</bundles_post_ra>
